<compile_context>
chip_gen: v7x
topology: tpu7x:2x2x1
jax: 0.10.0
libtpu: 0.0.40
codegen_flags: <defaults>
</compile_context>

<pallas_src>
import numpy as np
import jax
import jax.numpy as jnp
from jax.experimental import pallas as pl
from jax.experimental.pallas import tpu as pltpu


def _time_encode_kernel(ents_ref, ts_ref, freq_ref, phase_ref, out_ref):
    # ents_ref:  [B] int32 in SMEM (scalar prefetch; only used in index_maps)
    # ts_ref:    [TS, 1] f32
    # freq_ref:  [1, D]  f32
    # phase_ref: [1, D]  f32
    # out_ref:   [TS, D] out_dtype
    del ents_ref
    map_ts = ts_ref[...] * freq_ref[...] + phase_ref[...]   # [TS, D] broadcast
    out_ref[...] = jnp.cos(map_ts).astype(out_ref.dtype)


def time_encode(ts, basis_freq, phase, entities=None, *,
                seq_tile=1024, out_dtype=jnp.float32):
    """Pallas TimeEncode forward.

    ts: [B, S] timestamps.
    basis_freq / phase: [D] (shared) or [E, D] (entity-specific).
    entities: optional [B] int indices (required if params are entity-specific).
    """
    ts = jnp.asarray(ts, jnp.float32)
    B, S = ts.shape
    D = int(basis_freq.shape[-1])

    # Params as 2-D [rows, D]; shared case is a single row, entity case is [E, D].
    freq = jnp.asarray(basis_freq, jnp.float32).reshape(-1, D)
    phs = jnp.asarray(phase, jnp.float32).reshape(-1, D)
    if entities is None:
        ents = jnp.zeros((B,), jnp.int32)          # everyone reads row 0
    else:
        ents = jnp.asarray(entities, jnp.int32)    # per-batch param row

    # Sequence tile: multiple of 8 (sublane) or the full S.  Default ~0.5 MiB
    # output tiles at D=128 f32; double-buffered this stays far under the
    # scoped VMEM limit on every chip (incl. v7x's 64 MiB physical VMEM).
    ts_tile = min(int(seq_tile), S)
    if ts_tile != S:
        ts_tile = max(8, (ts_tile // 8) * 8)
    grid = (B, pl.cdiv(S, ts_tile))

    # Column view of ts so the kernel computes on clean 2-D [TS,1]x[1,D] tiles.
    ts_col = ts.reshape(B, S, 1)

    return pl.pallas_call(
        _time_encode_kernel,
        out_shape=jax.ShapeDtypeStruct((B, S, D), out_dtype),
        grid_spec=pltpu.PrefetchScalarGridSpec(
            num_scalar_prefetch=1,          # `ents` lands in SMEM
            grid=grid,
            in_specs=[
                # ts column tile for (batch b, seq tile s): kernel sees [TS, 1]
                pl.BlockSpec((None, ts_tile, 1), lambda b, s, e: (b, s, 0)),
                # per-batch frequency / phase row gathered via scalar prefetch
                pl.BlockSpec((1, D), lambda b, s, e: (e[b], 0)),
                pl.BlockSpec((1, D), lambda b, s, e: (e[b], 0)),
            ],
            # lane-dense 2-D output slab [TS, D]
            out_specs=pl.BlockSpec((None, ts_tile, D), lambda b, s, e: (b, s, 0)),
        ),
        compiler_params=pltpu.CompilerParams(
            dimension_semantics=("parallel", "parallel"),
            vmem_limit_bytes=32 * 1024 * 1024,
        ),
    )(ents, ts_col, freq, phs)


def make_params(expand_dim, entity_specific=False, num_entities=None):
    """Deterministic parameter init, mirroring TimeEncode.__init__."""
    base_freq = (1.0 / 10.0 ** np.linspace(0, 9, expand_dim)).astype(np.float32)
    if entity_specific:
        basis_freq = jnp.asarray(
            np.tile(base_freq[None, :], (num_entities, 1)))      # [E, D]
        phase = jnp.zeros((num_entities, expand_dim), jnp.float32)
    else:
        basis_freq = jnp.asarray(base_freq)                      # [D]
        phase = jnp.zeros((expand_dim,), jnp.float32)
    return basis_freq, phase


def _reference(ts, basis_freq, phase, entities=None):
    ts = jnp.asarray(ts, jnp.float32)[:, :, None]
    if entities is not None:
        f = basis_freq[entities][:, None, :]
        p = phase[entities][:, None, :]
    else:
        f = basis_freq.reshape(1, 1, -1)
        p = phase.reshape(1, 1, -1)
    return jnp.cos(ts * f + p)


if __name__ == "__main__":
    key = jax.random.PRNGKey(0)
    B, S, D, E = 4, 32, 128, 10

    k_ts, k_ent = jax.random.split(key)
    # Keep |ts * freq| moderate: cos of large f32 arguments is ill-conditioned,
    # so two bit-different-but-correct implementations (FMA order / transcendental
    # path) legitimately diverge by ~|arg|*eps; tolerances below account for that.
    ts = jax.random.uniform(k_ts, (B, S), jnp.float32, 0.0, 100.0)

    # --- shared (non entity-specific) path ---
    basis_freq, phase = make_params(D, entity_specific=False)
    out_shared = jax.block_until_ready(
        time_encode(ts, basis_freq, phase, seq_tile=16))   # grid = (4, 2)
    ref_shared = _reference(ts, basis_freq, phase)
    assert out_shared.shape == (B, S, D)
    np.testing.assert_allclose(np.asarray(out_shared), np.asarray(ref_shared),
                               rtol=2e-3, atol=2e-3)

    # --- entity-specific path ---
    basis_freq_e, phase_e = make_params(D, entity_specific=True, num_entities=E)
    # perturb phases deterministically so the gather actually matters
    phase_e = phase_e + 0.01 * jnp.arange(E, dtype=jnp.float32)[:, None]
    entities = jax.random.randint(k_ent, (B,), 0, E)
    out_ent = jax.block_until_ready(
        time_encode(ts, basis_freq_e, phase_e, entities=entities, seq_tile=16))
    ref_ent = _reference(ts, basis_freq_e, phase_e, entities=entities)
    assert out_ent.shape == (B, S, D)
    np.testing.assert_allclose(np.asarray(out_ent), np.asarray(ref_ent),
                               rtol=2e-3, atol=2e-3)

    print("KERNEL_OK")
</pallas_src>

<mosaic_0001>
module attributes {stable_mosaic.version = 11 : i64} {
  func.func @_time_encode_kernel(%arg0: i32, %arg1: i32, %arg2: memref<4xi32, #tpu.memory_space<smem>>, %arg3: memref<1x16x1xf32, #tpu.memory_space<vmem>>, %arg4: memref<1x128xf32, #tpu.memory_space<vmem>>, %arg5: memref<1x128xf32, #tpu.memory_space<vmem>>, %arg6: memref<1x16x128xf32, #tpu.memory_space<vmem>>) attributes {dimension_semantics = [#tpu.dimension_semantics<parallel>, #tpu.dimension_semantics<parallel>], iteration_bounds = array<i64: 4, 2>, scalar_prefetch = 1 : i64, scratch_operands = 0 : i64, tpu.core_type = #tpu.core_type<tc>, window_params = [{transform_indices = @transform_0, window_bounds = array<i64: 1, 16, 1>}, {transform_indices = @transform_1, window_bounds = array<i64: 1, 128>}, {transform_indices = @transform_2, window_bounds = array<i64: 1, 128>}, {transform_indices = @transform_3, window_bounds = array<i64: 1, 16, 128>}]} {
    %c0 = arith.constant 0 : index
    %c0_0 = arith.constant 0 : index
    %c0_1 = arith.constant 0 : index
    %0 = vector.load %arg3[%c0, %c0_0, %c0_1] : memref<1x16x1xf32, #tpu.memory_space<vmem>>, vector<1x16x1xf32>
    %1 = vector.shape_cast %0 : vector<1x16x1xf32> to vector<16x1xf32>
    %c0_2 = arith.constant 0 : index
    %c0_3 = arith.constant 0 : index
    %2 = vector.load %arg4[%c0_2, %c0_3] : memref<1x128xf32, #tpu.memory_space<vmem>>, vector<1x128xf32>
    %3 = vector.broadcast %1 : vector<16x1xf32> to vector<16x128xf32>
    %4 = vector.broadcast %2 : vector<1x128xf32> to vector<16x128xf32>
    %5 = arith.mulf %3, %4 : vector<16x128xf32>
    %c0_4 = arith.constant 0 : index
    %c0_5 = arith.constant 0 : index
    %6 = vector.load %arg5[%c0_4, %c0_5] : memref<1x128xf32, #tpu.memory_space<vmem>>, vector<1x128xf32>
    %7 = vector.broadcast %6 : vector<1x128xf32> to vector<16x128xf32>
    %8 = arith.addf %5, %7 : vector<16x128xf32>
    %9 = math.cos %8 : vector<16x128xf32>
    %c0_6 = arith.constant 0 : index
    %c0_7 = arith.constant 0 : index
    %c0_8 = arith.constant 0 : index
    %10 = vector.load %arg6[%c0_6, %c0_7, %c0_8] : memref<1x16x128xf32, #tpu.memory_space<vmem>>, vector<1x16x128xf32>
    %11 = vector.shape_cast %10 : vector<1x16x128xf32> to vector<16x128xf32>
    %12 = vector.shape_cast %9 : vector<16x128xf32> to vector<1x16x128xf32>
    tpu.vector_store %arg6[%c0_6, %c0_7, %c0_8], %12 {strides = array<i32>} : memref<1x16x128xf32, #tpu.memory_space<vmem>>, vector<1x16x128xf32>,
    return
  }
  func.func @transform_0(%arg0: i32, %arg1: i32, %arg2: memref<4xi32, #tpu.memory_space<smem>>) -> (i32, i32, i32) {
    %c0_i32 = arith.constant 0 : i32
    %c0_i32_0 = arith.constant 0 : i32
    return %arg0, %arg1, %c0_i32 : i32, i32, i32
  }
  func.func @transform_1(%arg0: i32, %arg1: i32, %arg2: memref<4xi32, #tpu.memory_space<smem>>) -> (i32, i32) {
    %0 = arith.index_cast %arg0 : i32 to index
    %1 = memref.load %arg2[%0] : memref<4xi32, #tpu.memory_space<smem>>
    %c0_i32 = arith.constant 0 : i32
    %c0_i32_0 = arith.constant 0 : i32
    return %1, %c0_i32 : i32, i32
  }
  func.func @transform_2(%arg0: i32, %arg1: i32, %arg2: memref<4xi32, #tpu.memory_space<smem>>) -> (i32, i32) {
    %0 = arith.index_cast %arg0 : i32 to index
    %1 = memref.load %arg2[%0] : memref<4xi32, #tpu.memory_space<smem>>
    %c0_i32 = arith.constant 0 : i32
    %c0_i32_0 = arith.constant 0 : i32
    return %1, %c0_i32 : i32, i32
  }
  func.func @transform_3(%arg0: i32, %arg1: i32, %arg2: memref<4xi32, #tpu.memory_space<smem>>) -> (i32, i32, i32) {
    %c0_i32 = arith.constant 0 : i32
    %c0_i32_0 = arith.constant 0 : i32
    return %arg0, %arg1, %c0_i32 : i32, i32, i32
  }
}

</mosaic_0001>

<bundles_post_ra>
// kernel: tpu_custom_call.1
= control target key start
LH: loop header
LB: loop body
LE: loop exit
PB: predicated region body
PF: predicated region fallthrough
CT: control target
= control target key end

     0   :  { %s1103_s0 = inlined_call_operand.vmem [shape: s32[4], index: 0, kind: input, shape index: {}]   ;;  %s1104_s1 = inlined_call_operand.vmem [shape: f32[4,32,1], index: 1, kind: input, shape index: {}]   ;;  %s1105_s2 = inlined_call_operand.vmem [shape: f32[1,128], index: 2, kind: input, shape index: {}]   ;;  %s1106_s3 = inlined_call_operand.vmem [shape: f32[1,128], index: 3, kind: input, shape index: {}]   ;;  %s1107_s4 = inlined_call_operand.hbm [shape: f32[4,32,128], index: 4, kind: output, shape index: {}]  }
   0x1   :  { %s9_s17 = sshll.u32 %s1103_s0, 4  ;;  %s10_s17 = int_to_ptr.vmem [resolvable:$true] %s9_s17 }
   0x2   :  { %s726_s18 = scalar_lea.vmem %s10_s17, 16  ;;  %p731_p1 = scmp.lt.s32.totalorder %s10_s17, %s10_s17 }
   0x3   :  { %p727_p0 = scmp.ne.s32.totalorder %s10_s17, %s726_s18  ;;  %p732_p2 = scmp.lt.s32.totalorder %s726_s18, %s726_s18 }
   0x5   :  { %p733_p3 = por %p732_p2, %p731_p1 }
   0x7   :  { %p734_p4 = pnand %p733_p3, %p727_p0 }
   0x9   :  { %737 = shalt.err (!%p734_p4)  }
   0xa   :  { %s836_s19 = smov [#allocation3]  }
   0xb   :  { %12 = dma.vmem_to_smem %s10_s17, 16, %s836_s19, [#allocation2] }
   0xc   :  { %798 = dma.done.wait [#allocation2], 16 }
   0xd   :  { %799 = vsyncadd [#allocation2], 4294967280 }
   0xe   :  { %14 = sfence }
   0xf   :  { %15 = vsyncpa [#allocation5], 0 }
  0x10   :  { %17 = vsyncpa [#allocation5 + $0x1], 0  ;;  %s875_s20 = smov 0   ;;  %s877_s21 = smov 0  }
  0x11   :  { %s879_s0 = smov 0   ;;  %s881_s22 = smov 0  }
  0x12   :  { %s883_s23 = smov 0   ;;  %s885_s24 = smov 0  }
  0x13   :  { %s887_s25 = smov 0   ;;  %s889_s26 = smov 0  }
  0x14 LB: > { %s603_s27 = sadd.s32 4294967295, %s834_s26   ;;  %s604_s28 = sadd.s32 4294967294, %s834_s26   ;;  %s834_s26 = sphi %s889_s26, %s23_s26   ;;  %s830_s25 = sphi %s887_s25, %s1118_s25   ;;  %s826_s24 = sphi %s885_s24, %s1117_s24   ;;  %s822_s23 = sphi %s883_s23, %s1116_s23   ;;  %s818_s22 = sphi %s881_s22, %s1115_s22   ;;  %s814_s0 = sphi %s879_s0, %s1114_s0   ;;  %s810_s21 = sphi %s877_s21, %s1113_s21   ;;  %s806_s20 = sphi %s875_s20, %s1112_s20  }
  0x15   : > { %s32_s29 = sadd.s32 1, %s826_s24  ;;  %s35_s30 = sadd.s32 1, %s830_s25 }
  0x16   : > { %p33_p5 = scmp.ge.s32.totalorder %s32_s29, 2  ;;  %p138_p6 = scmp.ne.s32.totalorder %s814_s0, %s810_s21 }
  0x17   : > { %p139_p7 = scmp.eq.s32.totalorder %s603_s27, 7  ;;  %p144_p10 = scmp.ne.s32.totalorder %s810_s21, %s806_s20 }
  0x18   : > { %s1120_s29 = smov (%p33_p5, %s32_s29), 0  ;;  %s1122_s30 = smov (!%p33_p5, %s35_s30), %s830_s25 }
  0x19   : > { %s124_s5 = ssub.s32 %s826_s24, %s1120_s29  ;;  %p926_p8 = por %p139_p7, %p138_p6 }
  0x1a   : > { %p37_p9 = scmp.ge.s32.totalorder %s1122_s30, 4  ;;  %p145_p11 = scmp.eq.s32.totalorder %s604_s28, 7 }
  0x1b   : > { %p607_p12 = scmp.ge.s32.totalorder %s834_s26, 1  ;;  %p192_p0 = scmp.lt.s32.totalorder %s834_s26, 9 }
  0x1c   : > { %s1124_s30 = smov (%p37_p9, %s1122_s30), 0  ;;  %p935_p13 = por %p145_p11, %p144_p10 }
  0x1d   : > { %s123_s8 = ssub.s32 %s830_s25, %s1124_s30  ;;  %s128_s9 = sadd.s32 1, %s814_s0 }
  0x1e   : > { %s125_s10 = sor.u32 %s124_s5, %s123_s8  ;;  %p193_p1 = pnand %p607_p12, %p192_p0 }
  0x1f   : > { %p126_p2 = scmp.eq.s32.totalorder %s125_s10, 0  ;;  %s947_s12 = sshll.u32 (!%p193_p1), %s818_s22, 1  ;;  %v837_v0 = vmov (!%p193_p1), 0   ;;  %v838_v27 = vmov (!%p193_p1), 683565275  }
  0x20   : > { %196 = sbr.rel (%p193_p1) target bundleno = 283 (0x11b), region = 32  ;;  %p229_p3 = scmp.lt.s32.totalorder (!%p193_p1), %s822_s23, 3  ;;  %717 = vset.pattern.permute.xlu0 (!%p193_p1), %v837_v0  ;;  %v839_v31 = vmov (!%p193_p1), 2475754826   ;;  %v840_v33 = vmov (!%p193_p1), 2131351028  }
  0x21   : > { %s944_s11 = scalar_select %p126_p2, %s814_s0, %s128_s9  }
  0x22   : > { %p231_p4 = scmp.lt.s32.totalorder (!%p193_p1), %s947_s12, 3  ;;  %s238_s22 = sld [smem:[#allocation3 + %s822_s23]] (!%p193_p1)  ;;  %v841_v35 = vmov (!%p193_p1), 2102212464   ;;  %v842_v37 = vmov (!%p193_p1), 920167782  }
  0x23   : > { %s243_s28 = sld [smem:[#allocation3 + %s822_s23]] (!%p193_p1)  ;;  %v843_v44 = vmov (!%p193_p1), 1326507024  }
  0x27   : > { %s230_s13 = scalar_select %p229_p3, %s822_s23, 3 }
  0x28   : > { %s232_s14 = scalar_select %p231_p4, %s947_s12, 3 }
  0x29   : > { %s610_s15 = sshll.u32 %s230_s13, 2  ;;  %p239_p5 = scmp.lt.s32.totalorder %s238_s22, 0 }
  0x2a   : > { %s234_s16 = sadd.s32 %s610_s15, %s232_s14  ;;  %p244_p6 = scmp.lt.s32.totalorder %s243_s28, 0 }
  0x2b   : > { %s611_s17 = sshll.u32 %s234_s16, 3  ;;  %s1126_s22 = smov (!%p239_p5, %s238_s22), 0 }
  0x2c   : > { %s236_s27 = scalar_lea.vmem %s1104_s1, %s611_s17  ;;  %s1128_s28 = smov (!%p244_p6, %s243_s28), 0 }
  0x2d   : > { %v249_v1 = vld [vmem:[%s236_s27] sm:$0xff]  ;;  %v250_v2 = vld [vmem:[%s236_s27 + $0x8] sm:$0xff]  ;;  %s241_s9 = scalar_lea.vmem %s1105_s2, %s1126_s22  ;;  %s246_s14 = scalar_lea.vmem %s1106_s3, %s1128_s28 }
  0x2e   : > { %254 = vperm.xlu0 %717, %v249_v1   ;;  %v612_v3 = vld [vmem:[%s241_s9] ss:$0 sm:$0xff]  ;;  %s225_s15 = sand.u32 1, %s810_s21   ;;  %s624_s17 = sshll.u32 %s822_s23, 2 }
  0x2f   : > { %v613_v4 = vld [vmem:[%s246_s14] ss:$0 sm:$0xff]  ;;  %s608_s16 = sshll.u32 %s225_s15, 4  ;;  %s500_s19 = sadd.s32 %s624_s17, %s947_s12 }
  0x30   : > { %s227_s18 = scalar_lea.vmem [#allocation4], %s608_s16  ;;  %s625_s27 = sshll.u32 %s500_s19, 7 }
  0x31   : > { %s503_s22 = sshll.u32 %s227_s18, 4  ;;  %s1044_s5 = scalar_lea.hbm %s1107_s4, %s625_s27  ;;  %s1046_s22 = int_to_ptr.vmem [resolvable:$true] %s503_s22 }
  0x32   : > { %259 = vperm.xlu0 %717, %v250_v2   ;;  %s1051_s12 = scalar_lea.sflag [#allocation5], %s225_s15  ;;  %s738_s8 = scalar_lea.vmem %s1046_s22, 256 }
  0x33   : > { %p739_p7 = scmp.ne.s32.totalorder %s1046_s22, %s738_s8  ;;  %s844_s9 = smov [#allocation4]  }
  0x34   : > { %s742_s10 = sshll.u32 %s844_s9, 4  ;;  %s743_s10 = int_to_ptr.vmem [resolvable:$false] %s742_s10 }
  0x35   : > { %p740_p9 = pnand %p739_p7, %p926_p8  ;;  %s744_s13 = scalar_lea.vmem %s743_s10, 512 }
  0x36   : > { %p745_p11 = scmp.lt.s32.totalorder %s1046_s22, %s743_s10  ;;  %p746_p12 = scmp.lt.s32.totalorder %s744_s13, %s738_s8 }
  0x37   : > { %p741_p10 = pneg %p740_p9 }
  0x38   : > { %p747_p0 = por %p746_p12, %p745_p11 }
  0x3a   : > { %p748_p1 = pnand %p747_p0, %p741_p10 }
  0xad   : > { %v255_v5 = vpop.permute.xlu0 %254 }
  0xae   : > { %v268_v6 = vmul.f32 %v612_v3, %v255_v5 }
  0xb0   : > { %v964_v7 = vadd.f32 %v613_v4, %v268_v6 }
  0xb1   : > { %v260_v8 = vpop.permute.xlu0 %259 }
  0xb2   : > { %v279_v9 = vand.u32 2147483647, %v964_v7  ;;  %v282_v10 = vand.u32 2139095040, %v964_v7  ;;  %v269_v11 = vmul.f32 %v612_v3, %v260_v8  ;;  %vm281_vm14 = vcmp.lt.s32.totalorder %v964_v7, 0 }
  0xb4   : > { %v283_v12 = vshrl.u32 %v282_v10, 23  ;;  %v968_v13 = vadd.f32 %v613_v4, %v269_v11  ;;  %v286_v14 = vand.u32 8388607, %v279_v9  ;;  %vm280_vm15 = vcmp.le.f32.partialorder %v279_v9, 0.7853982 }
  0xb6   : > { %v614_v15 = vadd.s32 4294967169, %v283_v12  ;;  %v385_v16 = vand.u32 2139095040, %v968_v13  ;;  %v287_v18 = vor.u32 8388608, %v286_v14  ;;  %v382_v20 = vand.u32 2147483647, %v968_v13 }
  0xb8   : > { %v289_v17 = vadd.s32 1, %v614_v15  ;;  %v386_v19 = vshrl.u32 %v385_v16, 23  ;;  %v974_v25 = vshll.u32 %v287_v18, 8  ;;  %v389_v29 = vand.u32 8388607, %v382_v20 }
  0xba   : > { %vm290_vm0 = vcmp.gt.s32.totalorder %v289_v17, 0  ;;  %v618_v22 = vadd.s32 4294967169, %v386_v19  ;;  %v390_v59 = vor.u32 8388608, %v389_v29 }
  0xbb   : > { %v291_v21 = vsel %vm290_vm0, %v289_v17, 0  ;;  %vm384_vm0 = vcmp.lt.s32.totalorder %v968_v13, 0 }
  0xbc   : > { %v292_v23 = vshrl.u32 %v291_v21, 5  ;;  %v293_v24 = vand.u32 31, %v291_v21  ;;  %v392_v30 = vadd.s32 1, %v618_v22  ;;  %v430_v10 = vshll.u32 %v390_v59, 8 }
  0xbe   : > { %v294_v26 = vsub.s32 32, %v293_v24  ;;  %v296_v28 = vshll.u32 %v838_v27, %v293_v24  ;;  %v299_v32 = vshll.u32 %v839_v31, %v293_v24  ;;  %v302_v34 = vshll.u32 %v840_v33, %v293_v24 }
  0xbf   : > { %v305_v36 = vshll.u32 %v841_v35, %v293_v24  ;;  %v308_v38 = vshll.u32 %v842_v37, %v293_v24  ;;  %vm311_vm1 = vcmp.lt.s32.totalorder %v292_v23, 1  ;;  %vm313_vm2 = vcmp.lt.s32.totalorder %v292_v23, 3 }
  0xc0   : > { %v297_v39 = vshrl.u32 %v839_v31, %v294_v26  ;;  %v300_v40 = vshrl.u32 %v840_v33, %v294_v26  ;;  %v303_v41 = vshrl.u32 %v841_v35, %v294_v26  ;;  %v295_v42 = vshrl.u32 %v838_v27, %v294_v26 }
  0xc1   : > { %v306_v43 = vshrl.u32 %v842_v37, %v294_v26  ;;  %v309_v45 = vshrl.u32 %v843_v44, %v294_v26  ;;  %vm393_vm3 = vcmp.gt.s32.totalorder %v392_v30, 0  ;;  %vm314_vm4 = vcmp.lt.s32.totalorder %v292_v23, 4 }
  0xc2   : > { %v298_v46 = vor.u32 %v297_v39, %v296_v28  ;;  %v301_v47 = vor.u32 %v300_v40, %v299_v32  ;;  %v304_v48 = vor.u32 %v303_v41, %v302_v34  ;;  %v394_v51 = vsel %vm393_vm3, %v392_v30, 0 }
  0xc3   : > { %v307_v49 = vor.u32 %v306_v43, %v305_v36  ;;  %v310_v50 = vor.u32 %v309_v45, %v308_v38  ;;  %vm312_vm5 = vcmp.lt.s32.totalorder %v292_v23, 2  ;;  %v396_v62 = vand.u32 31, %v394_v51 }
  0xc4   : > { %v315_v52 = vsel %vm311_vm1, %v295_v42, %v298_v46  ;;  %v316_v53 = vsel %vm314_vm4, %v304_v48, 2102212464  ;;  %v319_v54 = vsel %vm311_vm1, %v298_v46, %v301_v47  ;;  %v323_v55 = vsel %vm311_vm1, %v301_v47, %v304_v48 }
  0xc5   : > { %v317_v56 = vsel %vm313_vm2, %v301_v47, %v316_v53  ;;  %v320_v57 = vsel %vm314_vm4, %v307_v49, 920167782  ;;  %v324_v58 = vsel %vm314_vm4, %v310_v50, 1326507024  ;;  %v395_v6 = vshrl.u32 %v394_v51, 5 }
  0xc6   : > { %v321_v60 = vsel %vm313_vm2, %v304_v48, %v320_v57  ;;  %v325_v61 = vsel %vm313_vm2, %v307_v49, %v324_v58  ;;  %v318_v63 = vsel %vm312_vm5, %v315_v52, %v317_v56  ;;  %v397_v8 = vsub.s32 32, %v396_v62 }
  0xc7   : > { %v322_v0 = vsel %vm312_vm5, %v319_v54, %v321_v60  ;;  %v326_v1 = vsel %vm312_vm5, %v323_v55, %v325_v61  ;;  %v334_v11 = vmul.u32 %v974_v25, %v318_v63  ;;  %v399_v12 = vshll.u32 %v838_v27, %v396_v62 }
  0xc8   : > { %v987_v2 = vmul.u32.u64.low %v974_v25, %v326_v1  ;;  %v988_v3 = vmul.u32.u64.high %v974_v25, %v326_v1, %v987_v2  ;;  %v991_v4 = vmul.u32.u64.low %v974_v25, %v322_v0  ;;  %v992_v5 = vmul.u32.u64.high %v974_v25, %v322_v0, %v991_v4 }
  0xc9   : > { %v402_v14 = vshll.u32 %v839_v31, %v396_v62  ;;  %v405_v15 = vshll.u32 %v840_v33, %v396_v62  ;;  %v400_v16 = vshrl.u32 %v839_v31, %v397_v8  ;;  %v403_v17 = vshrl.u32 %v840_v33, %v397_v8 }
  0xca   : > { %v406_v18 = vshrl.u32 %v841_v35, %v397_v8  ;;  %v408_v19 = vshll.u32 %v841_v35, %v396_v62  ;;  %vm336_vm6 = vc.u32 %v988_v3, %v991_v4  ;;  %v337_v21 = vadd.s32 1, %v992_v5 }
  0xcb   : > { %v409_v22 = vshrl.u32 %v842_v37, %v397_v8  ;;  %v411_v23 = vshll.u32 %v842_v37, %v396_v62  ;;  %v401_v24 = vor.u32 %v400_v16, %v399_v12  ;;  %v404_v26 = vor.u32 %v403_v17, %v402_v14 }
  0xcc   : > { %v407_v28 = vor.u32 %v406_v18, %v405_v15  ;;  %v412_v29 = vshrl.u32 %v843_v44, %v397_v8  ;;  %v338_v25 = vsel %vm336_vm6, %v337_v21, %v992_v5  ;;  %vm414_vm7 = vcmp.lt.s32.totalorder %v395_v6, 1 }
  0xcd   : > { %v410_v30 = vor.u32 %v409_v22, %v408_v19  ;;  %vm417_vm8 = vcmp.lt.s32.totalorder %v395_v6, 4  ;;  %v339_v31 = vadd.s32 %v338_v25, %v334_v11  ;;  %vm416_vm9 = vcmp.lt.s32.totalorder %v395_v6, 3 }
  0xce   : > { %v413_v32 = vor.u32 %v412_v29, %v411_v23  ;;  %v419_v33 = vsel %vm417_vm8, %v407_v28, 2102212464  ;;  %v398_v34 = vshrl.u32 %v838_v27, %v397_v8  ;;  %v422_v35 = vsel %vm414_vm7, %v401_v24, %v404_v26 }
  0xcf   : > { %v423_v36 = vsel %vm417_vm8, %v410_v30, 920167782  ;;  %v426_v38 = vsel %vm414_vm7, %v404_v26, %v407_v28  ;;  %v340_v39 = vadd.s32 536870912, %v339_v31  ;;  %vm415_vm10 = vcmp.lt.s32.totalorder %v395_v6, 2 }
  0xd0   : > { %v424_v37 = vsel %vm416_vm9, %v407_v28, %v423_v36  ;;  %v427_v40 = vsel %vm417_vm8, %v413_v32, 1326507024  ;;  %v418_v41 = vsel %vm414_vm7, %v398_v34, %v401_v24  ;;  %v420_v42 = vsel %vm416_vm9, %v404_v26, %v419_v33 }
  0xd1   : > { %v425_v43 = vsel %vm415_vm10, %v422_v35, %v424_v37  ;;  %v428_v44 = vsel %vm416_vm9, %v410_v30, %v427_v40  ;;  %v341_v45 = vshrl.u32 %v340_v39, 30  ;;  %v421_v51 = vsel %vm415_vm10, %v418_v41, %v420_v42 }
  0xd2   : > { %v429_v46 = vsel %vm415_vm10, %v426_v38, %v428_v44  ;;  %v1002_v47 = vmul.u32.u64.low %v430_v10, %v425_v43  ;;  %v1003_v48 = vmul.u32.u64.high %v430_v10, %v425_v43, %v1002_v47  ;;  %v437_v54 = vmul.u32 %v430_v10, %v421_v51 }
  0xd3   : > { %v1005_v49 = vmul.u32.u64.low %v430_v10, %v429_v46  ;;  %v1006_v50 = vmul.u32.u64.high %v430_v10, %v429_v46, %v1005_v49  ;;  %v342_v27 = vshll.u32 %v341_v45, 30  ;;  %v335_v2 = vadd.s32 %v991_v4, %v988_v3 }
  0xd4   : > { %v440_v53 = vadd.s32 1, %v1003_v48  ;;  %v365_v32 = vsub.s32 4, %v341_v45  ;;  %vm1025_vm1 = vcmp.le.f32.partialorder %v382_v20, 0.7853982  ;;  %vm371_vm5 = vweird.f32 %v964_v7 }
  0xd5   : > { %v343_v52 = vsub.s32 %v339_v31, %v342_v27  ;;  %vm439_vm11 = vc.u32 %v1006_v50, %v1002_v47  ;;  %v438_v26 = vadd.s32 %v1002_v47, %v1006_v50  ;;  %vm474_vm9 = vweird.f32 %v968_v13 }
  0xd6   : > { %v441_v56 = vsel %vm439_vm11, %v440_v53, %v1003_v48  ;;  %v366_v38 = vsel %vm281_vm14, %v365_v32, %v341_v45 }
  0xd7   : > { %v345_v55 = vsub.s32 0, %v343_v52  ;;  %v442_v57 = vadd.s32 %v441_v56, %v437_v54  ;;  %v368_v40 = vsel %vm280_vm15, 0, %v366_v38 }
  0xd8   : > { %v372_v43 = vand.u32 3, %v368_v40 }
  0xd9   : > { %v615_v58 = vmin.u32 %v345_v55, %v343_v52  ;;  %v443_v59 = vadd.s32 536870912, %v442_v57 }
  0xda   : > { %vm377_vm2 = vcmp.eq.s32.totalorder %v372_v43, 2  ;;  %vm374_vm3 = vcmp.eq.s32.totalorder %v372_v43, 0  ;;  %vm373_vm4 = vcmp.lt.s32.totalorder %v372_v43, 2 }
  0xdb   : > { %v347_v60 = vclz %v615_v58  ;;  %v1011_v61 = vshrl.u32 %v443_v59, 30 }
  0xdd   : > { %v616_v62 = vadd.s32 4294967294, %v347_v60  ;;  %v445_v63 = vshll.u32 %v1011_v61, 30  ;;  %v468_v45 = vsub.s32 4, %v1011_v61 }
  0xdf   : > { %vm617_vm12 = vcmp.lt.s32.totalorder %v616_v62, 0  ;;  %v446_v1 = vsub.s32 %v442_v57, %v445_v63  ;;  %v469_v50 = vsel %vm384_vm0, %v468_v45, %v1011_v61 }
  0xe0   : > { %v350_v0 = vsel %vm617_vm12, 0, %v616_v62  ;;  %v471_v53 = vsel %vm1025_vm1, 0, %v469_v50 }
  0xe1   : > { %v351_v5 = vsub.s32 32, %v350_v0  ;;  %v355_v6 = vsub.s32 4294967266, %v350_v0  ;;  %v448_v8 = vsub.s32 0, %v446_v1  ;;  %v352_v10 = vshll.u32 %v343_v52, %v350_v0 }
  0xe2   : > { %v475_v55 = vand.u32 3, %v471_v53 }
  0xe3   : > { %v353_v11 = vshrl.u32 %v335_v2, %v351_v5  ;;  %v356_v12 = vadd.s32 127, %v355_v6  ;;  %v619_v14 = vmin.u32 %v448_v8, %v446_v1 }
  0xe4   : > { %vm480_vm6 = vcmp.eq.s32.totalorder %v475_v55, 2  ;;  %vm477_vm7 = vcmp.eq.s32.totalorder %v475_v55, 0  ;;  %vm476_vm8 = vcmp.lt.s32.totalorder %v475_v55, 2 }
  0xe5   : > { %v354_v15 = vor.u32 %v353_v11, %v352_v10  ;;  %v357_v16 = vshll.u32 %v356_v12, 23  ;;  %v450_v17 = vclz %v619_v14 }
  0xe7   : > { %v358_v18 = vor.u32 4788187, %v357_v16  ;;  %v620_v19 = vadd.s32 4294967294, %v450_v17  ;;  %v361_v22 = vcvt.s32.f32 %v354_v15 }
  0xe9   : > { %v359_v21 = vand.u32 2147483647, %v358_v18  ;;  %vm621_vm13 = vcmp.lt.s32.totalorder %v620_v19, 0 }
  0xea   : > { %v453_v24 = vsel %vm621_vm13, 0, %v620_v19 }
  0xeb   : > { %v362_v23 = vmul.f32 %v361_v22, %v359_v21  ;;  %v454_v3 = vsub.s32 32, %v453_v24  ;;  %v458_v4 = vsub.s32 4294967266, %v453_v24  ;;  %v455_v29 = vshll.u32 %v446_v1, %v453_v24 }
  0xed   : > { %v363_v28 = vxor.u32 2147483648, %v362_v23  ;;  %v456_v25 = vshrl.u32 %v438_v26, %v454_v3  ;;  %v459_v30 = vadd.s32 127, %v458_v4 }
  0xef   : > { %v364_v31 = vsel %vm281_vm14, %v363_v28, %v362_v23  ;;  %v457_v34 = vor.u32 %v456_v25, %v455_v29  ;;  %v460_v35 = vshll.u32 %v459_v30, 23 }
  0xf0   : > { %v367_v33 = vsel %vm280_vm15, %v964_v7, %v364_v31 }
  0xf1   : > { %718 = vcosq.f32 %v367_v33  ;;  %v461_v36 = vor.u32 4788187, %v460_v35  ;;  %v464_v37 = vcvt.s32.f32 %v457_v34 }
  0xf2   : > { %720 = vsinq.f32 %v367_v33 }
  0xf3   : > { %v462_v39 = vand.u32 2147483647, %v461_v36 }
  0xf5   : > { %v465_v41 = vmul.f32 %v464_v37, %v462_v39 }
  0xf7   : > { %v466_v42 = vxor.u32 2147483648, %v465_v41 }
  0xf9   : > { %v467_v44 = vsel %vm384_vm0, %v466_v42, %v465_v41 }
  0xfa   : > { %v470_v47 = vsel %vm1025_vm1, %v968_v13, %v467_v44 }
  0xfb   : > { %v719_v46 = vpop.eup %718  ;;  %722 = vcosq.f32 %v470_v47 }
  0xfc   : > { %v721_v48 = vpop.eup %720  ;;  %v378_v49 = vxor.u32 2147483648, %v719_v46  ;;  %724 = vsinq.f32 %v470_v47 }
  0xfd   : > { %v375_v20 = vxor.u32 2147483648, %v721_v48 }
  0xfe   : > { %v379_v27 = vsel %vm377_vm2, %v378_v49, %v721_v48 }
  0xff   : > { %v376_v51 = vsel %vm374_vm3, %v719_v46, %v375_v20 }
 0x100   : > { %v380_v52 = vsel %vm373_vm4, %v376_v51, %v379_v27 }
 0x101   : > { %v381_v54 = vsel %vm371_vm5, nan, %v380_v52 }
 0x102   : > { %485 = vst [vmem:[%s227_s18] sm:$0xff] %v381_v54 }
 0x105   : > { %v723_v56 = vpop.eup %722 }
 0x106   : > { %v725_v57 = vpop.eup %724  ;;  %v481_v58 = vxor.u32 2147483648, %v723_v56 }
 0x107   : > { %v478_v59 = vxor.u32 2147483648, %v725_v57 }
 0x108   : > { %v482_v7 = vsel %vm480_vm6, %v481_v58, %v725_v57 }
 0x109   : > { %v479_v60 = vsel %vm477_vm7, %v723_v56, %v478_v59 }
 0x10a   : > { %v483_v61 = vsel %vm476_vm8, %v479_v60, %v482_v7 }
 0x10b   : > { %v484_v62 = vsel %vm474_vm9, nan, %v483_v61 }
 0x10c   : > { %486 = vst [vmem:[%s227_s18 + $0x8] sm:$0xff] %v484_v62 }
 0x10d   : > { %751 = shalt.err (!%p748_p1)
}
 0x10e   : > { %s752_s14 = scalar_lea.hbm %s1044_s5, 256  ;;  %s756_s17 = scalar_lea.hbm %s1107_s4, 2048 }
 0x10f   : > { %p753_p2 = scmp.ne.s32.totalorder %s1044_s5, %s752_s14  ;;  %p757_p5 = scmp.lt.u32.totalorder %s1044_s5, %s1107_s4 }
 0x110   : > { %p758_p6 = scmp.lt.u32.totalorder %s756_s17, %s752_s14  ;;  %p760_p9 = scmp.lt.u32.totalorder %s752_s14, %s1044_s5 }
 0x111   : > { %p754_p3 = pnand %p753_p2, %p926_p8 }
 0x112   : > { %p759_p7 = por %p758_p6, %p757_p5 }
 0x113   : > { %p755_p4 = pneg %p754_p3 }
 0x114   : > { %p761_p10 = por %p760_p9, %p759_p7 }
 0x116   : > { %p762_p11 = pnand %p761_p10, %p755_p4 }
 0x118   : > { %765 = shalt.err (!%p762_p11)
}
 0x119   : > { %s845_s27 = smov 128   ;;  %s846_s23 = smov 8  }
 0x11a   : > { %636 = dma.vmem_to_hbm [thread:$0]  (%p926_p8), %s1046_s22, 256, %s1044_s5, %s1051_s12, %s845_s27, %s845_s27, %s846_s23  }
 0x11b PF: > { %p642_p12 = scmp.ge.s32.totalorder %s834_s26, 2  ;;  %s518_s28 = sand.u32 1, %s806_s20  }
 0x11c   : > { %s519_s8 = scalar_lea.sflag [#allocation5], %s518_s28 }
 0x11d   : > { %p639_p0 = pnand %p642_p12, %p935_p13 }
 0x11f   : > { %801 = dma.done.wait (!%p639_p0), %s519_s8, 256  }
 0x120   : > { %803 = vsyncadd (!%p639_p0), %s519_s8, 4294967040  ;;  %s23_s26 = sadd.s32 1, %s834_s26   ;;  %s1112_s20 = smov %s810_s21 }
 0x121   : > { %p20_p1 = scmp.ge.s32.totalorder %s23_s26, 10   ;;  %s1113_s21 = smov %s814_s0 }
 0x122   : > { %s1114_s0 = smov %s944_s11  ;;  %s1115_s22 = smov %s826_s24 }
 0x123   : > { %s1116_s23 = smov %s830_s25  ;;  %s1117_s24 = smov %s1120_s29 }
 0x124   : > { %s1118_s25 = smov %s1124_s30  ;;  %22 = sbr.rel (!%p20_p1) target bundleno = 20 (0x14), region = 73 }
 0x12b   :  { %524 = vsyncpa [#allocation5], 1 }
 0x12c   :  { %526 = vsyncpa [#allocation5 + $0x1], 1 }

</bundles_post_ra>
